<compile_context>
chip_gen: v6e
topology: v6e:2x2x1
jax: 0.10.0
libtpu: 0.0.40
codegen_flags: <defaults>
</compile_context>

<pallas_src>
import functools

import jax
import jax.numpy as jnp
from jax.experimental import pallas as pl
from jax.experimental.pallas import tpu as pltpu


def _encoder_e_kernel(seed_ref, x_ref,
                      w0_ref, b0_ref, w1_ref, b1_ref, w2_ref, b2_ref,
                      w3_ref, b3_ref, w4_ref,
                      y_ref,
                      *, keep_scale, drop_threshold, apply_dropout,
                      in_dim, batch_tile):
    # Dropout / ELU elementwise math stays in f32 (v5e has no bf16 VPU/EUP).
    x = x_ref[...].astype(jnp.float32)

    if apply_dropout:
        # Counter-based hash PRNG: hash(global_flat_index ^ mix(seed)).
        # Invariant to tile size, independent across tiles (no reused stream).
        seed_u = seed_ref[0].astype(jnp.uint32)
        row0 = (pl.program_id(0) * batch_tile).astype(jnp.uint32)
        rows = jax.lax.broadcasted_iota(jnp.int32, x.shape, 0).astype(jnp.uint32) + row0
        cols = jax.lax.broadcasted_iota(jnp.int32, x.shape, 1).astype(jnp.uint32)
        h32 = rows * jnp.uint32(in_dim) + cols
        h32 = h32 ^ (seed_u * jnp.uint32(0x9E3779B9))
        h32 = h32 ^ (h32 >> 16)
        h32 = h32 * jnp.uint32(0x7FEB352D)
        h32 = h32 ^ (h32 >> 15)
        h32 = h32 * jnp.uint32(0x846CA68B)
        h32 = h32 ^ (h32 >> 16)
        # Integer-domain threshold compare (no float convert): P(drop) = p.
        keep = h32 >= jnp.uint32(drop_threshold)
        x = jnp.where(keep, x * jnp.float32(keep_scale), 0.0)

    # fc0 + ELU(alpha=1)   (bf16 MXU operands, f32 accumulation)
    h = jnp.dot(x.astype(jnp.bfloat16), w0_ref[...],
                preferred_element_type=jnp.float32) + b0_ref[...]
    h = jnp.where(h > 0.0, h, jnp.exp(h) - 1.0)

    # fc1..fc3 + ReLU
    h = jnp.maximum(
        jnp.dot(h.astype(jnp.bfloat16), w1_ref[...],
                preferred_element_type=jnp.float32) + b1_ref[...], 0.0)
    h = jnp.maximum(
        jnp.dot(h.astype(jnp.bfloat16), w2_ref[...],
                preferred_element_type=jnp.float32) + b2_ref[...], 0.0)
    h = jnp.maximum(
        jnp.dot(h.astype(jnp.bfloat16), w3_ref[...],
                preferred_element_type=jnp.float32) + b3_ref[...], 0.0)

    # fc4 (no bias), lane-dense (columns padded to a multiple of 128 outside).
    y_ref[...] = jnp.dot(h.astype(jnp.bfloat16), w4_ref[...],
                         preferred_element_type=jnp.float32)


def encoder_e_forward(x, params, *, seed=0, dropout_p=0.5, training=True,
                      eps=1e-5, batch_tile=256, running_stats=None):
    """params = (w0, b0, w1, b1, w2, b2, w3, b3, w4); weights are (in, out)."""
    n, in_dim = x.shape
    w0, b0, w1, b1, w2, b2, w3, b3, w4 = params
    int_dim = w0.shape[1]
    out_dim = w4.shape[1]
    out_pad = ((out_dim + 127) // 128) * 128            # lane-dense output slab

    # bf16 weights (native MXU path, half the weight DMA); biases stay f32.
    to_bf16 = lambda w: w.astype(jnp.bfloat16)
    w0b, w1b, w2b, w3b = to_bf16(w0), to_bf16(w1), to_bf16(w2), to_bf16(w3)
    w4b = jnp.pad(w4, ((0, 0), (0, out_pad - out_dim))).astype(jnp.bfloat16)
    b0f = b0.reshape(1, -1).astype(jnp.float32)
    b1f = b1.reshape(1, -1).astype(jnp.float32)
    b2f = b2.reshape(1, -1).astype(jnp.float32)
    b3f = b3.reshape(1, -1).astype(jnp.float32)

    # Batch tile: multiple of 8 sublanes; pad batch to a whole number of tiles.
    tb = min(batch_tile, n)
    tb = ((tb + 7) // 8) * 8
    n_pad = ((n + tb - 1) // tb) * tb
    xb = x.astype(jnp.bfloat16)
    if n_pad != n:
        xb = jnp.pad(xb, ((0, n_pad - n), (0, 0)))

    seed_arr = jnp.asarray([seed], dtype=jnp.int32)
    p = float(dropout_p)
    drop_threshold = min(int(round(p * 4294967296.0)), 4294967295)
    keep_scale = (1.0 / (1.0 - p)) if p < 1.0 else 0.0

    kernel = functools.partial(
        _encoder_e_kernel,
        keep_scale=keep_scale,
        drop_threshold=drop_threshold,
        apply_dropout=bool(training) and p > 0.0,
        in_dim=in_dim,
        batch_tile=tb)

    resident = lambda shape: pl.BlockSpec(shape, lambda i, s: (0, 0))
    grid_spec = pltpu.PrefetchScalarGridSpec(
        num_scalar_prefetch=1,
        grid=(n_pad // tb,),
        in_specs=[
            pl.BlockSpec((tb, in_dim), lambda i, s: (i, 0)),     # x tile (streamed)
            resident((in_dim, int_dim)), resident((1, int_dim)),  # fc0
            resident((int_dim, int_dim)), resident((1, int_dim)), # fc1
            resident((int_dim, int_dim)), resident((1, int_dim)), # fc2
            resident((int_dim, int_dim)), resident((1, int_dim)), # fc3
            resident((int_dim, out_pad)),                          # fc4 (padded)
        ],
        out_specs=pl.BlockSpec((tb, out_pad), lambda i, s: (i, 0)),
    )

    y = pl.pallas_call(
        kernel,
        out_shape=jax.ShapeDtypeStruct((n_pad, out_pad), jnp.float32),
        grid_spec=grid_spec,
        compiler_params=pltpu.CompilerParams(
            dimension_semantics=("parallel",)),   # megacore sharding on v7x
    )(seed_arr, xb, w0b, b0f, w1b, b1f, w2b, b2f, w3b, b3f, w4b)

    y = y[:n, :out_dim]

    # BatchNorm1d(affine=False, eps): batch-wide stats on the tiny (n, out_dim)
    # slab, done in XLA since the kernel is batch-tiled (review option (b)).
    if training or running_stats is None:
        # TODO(synk): eval mode with tracked running stats should pass
        # running_stats=(mean, var); otherwise batch stats are used here.
        mean = jnp.mean(y, axis=0, keepdims=True)
        var = jnp.mean((y - mean) ** 2, axis=0, keepdims=True)   # biased var
    else:
        mean, var = running_stats
        mean = mean.reshape(1, -1)
        var = var.reshape(1, -1)
    return (y - mean) * jax.lax.rsqrt(var + jnp.float32(eps))


def _init_linear(key, fan_in, fan_out, bias=True):
    # Deterministic stand-in for nn.Linear's default init (uniform +-1/sqrt(fan_in)).
    bound = 1.0 / (fan_in ** 0.5)
    kw, kb = jax.random.split(key)
    w = jax.random.uniform(kw, (fan_in, fan_out), jnp.float32, -bound, bound)
    if not bias:
        return w
    b = jax.random.uniform(kb, (fan_out,), jnp.float32, -bound, bound)
    return w, b


def _reference_no_dropout(x, params, eps=1e-5):
    # Pure-JAX reference matching the kernel's bf16 weight/activation casts.
    w0, b0, w1, b1, w2, b2, w3, b3, w4 = params
    bf = jnp.bfloat16
    h = jnp.dot(x.astype(bf), w0.astype(bf),
                preferred_element_type=jnp.float32) + b0.reshape(1, -1)
    h = jnp.where(h > 0.0, h, jnp.exp(h) - 1.0)
    for w, b in ((w1, b1), (w2, b2), (w3, b3)):
        h = jnp.maximum(
            jnp.dot(h.astype(bf), w.astype(bf),
                    preferred_element_type=jnp.float32) + b.reshape(1, -1), 0.0)
    y = jnp.dot(h.astype(bf), w4.astype(bf), preferred_element_type=jnp.float32)
    mean = jnp.mean(y, axis=0, keepdims=True)
    var = jnp.mean((y - mean) ** 2, axis=0, keepdims=True)
    return (y - mean) * jax.lax.rsqrt(var + jnp.float32(eps))


if __name__ == "__main__":
    # Small shapes consistent with the module (in_dim, int_dim, out_dim).
    N, in_dim, int_dim, out_dim = 20, 256, 64, 4

    key = jax.random.PRNGKey(0)
    kx, k0, k1, k2, k3, k4 = jax.random.split(key, 6)

    x = jax.random.normal(kx, (N, in_dim), dtype=jnp.float32)
    w0, b0 = _init_linear(k0, in_dim, int_dim)
    w1, b1 = _init_linear(k1, int_dim, int_dim)
    w2, b2 = _init_linear(k2, int_dim, int_dim)
    w3, b3 = _init_linear(k3, int_dim, int_dim)
    w4 = _init_linear(k4, int_dim, out_dim, bias=False)
    params = (w0, b0, w1, b1, w2, b2, w3, b3, w4)

    # Training mode: dropout active, batch-stat BN.
    z = encoder_e_forward(x, params, seed=0, dropout_p=0.5, training=True)
    z = jax.block_until_ready(z)
    assert z.shape == (N, out_dim) and z.dtype == jnp.float32
    assert bool(jnp.all(jnp.isfinite(z)))

    # Deterministic path (dropout off) vs. pure-JAX reference.
    z_eval = jax.block_until_ready(
        encoder_e_forward(x, params, seed=0, dropout_p=0.5, training=False))
    z_ref = _reference_no_dropout(x, params)
    assert jnp.allclose(z_eval, z_ref, atol=5e-2, rtol=5e-2), \
        float(jnp.max(jnp.abs(z_eval - z_ref)))

    print("KERNEL_OK")
</pallas_src>

<mosaic_0001>
module attributes {stable_mosaic.version = 11 : i64} {
  func.func @_encoder_e_kernel(%arg0: i32, %arg1: memref<1xi32, #tpu.memory_space<smem>>, %arg2: memref<24x256xbf16, #tpu.memory_space<vmem>>, %arg3: memref<256x64xbf16, #tpu.memory_space<vmem>>, %arg4: memref<1x64xf32, #tpu.memory_space<vmem>>, %arg5: memref<64x64xbf16, #tpu.memory_space<vmem>>, %arg6: memref<1x64xf32, #tpu.memory_space<vmem>>, %arg7: memref<64x64xbf16, #tpu.memory_space<vmem>>, %arg8: memref<1x64xf32, #tpu.memory_space<vmem>>, %arg9: memref<64x64xbf16, #tpu.memory_space<vmem>>, %arg10: memref<1x64xf32, #tpu.memory_space<vmem>>, %arg11: memref<64x128xbf16, #tpu.memory_space<vmem>>, %arg12: memref<24x128xf32, #tpu.memory_space<vmem>>) attributes {dimension_semantics = [#tpu.dimension_semantics<parallel>], iteration_bounds = array<i64: 1>, scalar_prefetch = 1 : i64, scratch_operands = 0 : i64, tpu.core_type = #tpu.core_type<tc>, window_params = [{transform_indices = @transform_0, window_bounds = array<i64: 24, 256>}, {pipeline_mode = #tpu.pipeline_mode<synchronous>, transform_indices = @transform_1, window_bounds = array<i64: 256, 64>}, {pipeline_mode = #tpu.pipeline_mode<synchronous>, transform_indices = @transform_2, window_bounds = array<i64: 1, 64>}, {pipeline_mode = #tpu.pipeline_mode<synchronous>, transform_indices = @transform_3, window_bounds = array<i64: 64, 64>}, {pipeline_mode = #tpu.pipeline_mode<synchronous>, transform_indices = @transform_4, window_bounds = array<i64: 1, 64>}, {pipeline_mode = #tpu.pipeline_mode<synchronous>, transform_indices = @transform_5, window_bounds = array<i64: 64, 64>}, {pipeline_mode = #tpu.pipeline_mode<synchronous>, transform_indices = @transform_6, window_bounds = array<i64: 1, 64>}, {pipeline_mode = #tpu.pipeline_mode<synchronous>, transform_indices = @transform_7, window_bounds = array<i64: 64, 64>}, {pipeline_mode = #tpu.pipeline_mode<synchronous>, transform_indices = @transform_8, window_bounds = array<i64: 1, 64>}, {pipeline_mode = #tpu.pipeline_mode<synchronous>, transform_indices = @transform_9, window_bounds = array<i64: 64, 128>}, {transform_indices = @transform_10, window_bounds = array<i64: 24, 128>}]} {
    %c0 = arith.constant 0 : index
    %c0_0 = arith.constant 0 : index
    %0 = vector.load %arg2[%c0, %c0_0] : memref<24x256xbf16, #tpu.memory_space<vmem>>, vector<24x256xbf16>
    %1 = arith.extf %0 : vector<24x256xbf16> to vector<24x256xf32>
    %c0_1 = arith.constant 0 : index
    %2 = memref.load %arg1[%c0_1] : memref<1xi32, #tpu.memory_space<smem>>
    %c24_i32 = arith.constant 24 : i32
    %3 = arith.muli %arg0, %c24_i32 : i32
    %4 = tpu.iota {dimensions = array<i32: 0>} : vector<24x256xi32>
    %5 = vector.broadcast %3 : i32 to vector<24x256xi32>
    %6 = arith.addi %4, %5 : vector<24x256xi32>
    %7 = tpu.iota {dimensions = array<i32: 1>} : vector<24x256xi32>
    %c256_i32 = arith.constant 256 : i32
    %8 = vector.broadcast %c256_i32 : i32 to vector<24x256xi32>
    %9 = arith.muli %6, %8 : vector<24x256xi32>
    %10 = arith.addi %9, %7 : vector<24x256xi32>
    %c-1640531527_i32 = arith.constant -1640531527 : i32
    %11 = arith.muli %2, %c-1640531527_i32 : i32
    %12 = vector.broadcast %11 : i32 to vector<24x256xi32>
    %13 = arith.xori %10, %12 : vector<24x256xi32>
    %c16_i32 = arith.constant 16 : i32
    %14 = vector.broadcast %c16_i32 : i32 to vector<24x256xi32>
    %15 = arith.shrui %13, %14 : vector<24x256xi32>
    %16 = arith.xori %13, %15 : vector<24x256xi32>
    %c2146121005_i32 = arith.constant 2146121005 : i32
    %17 = vector.broadcast %c2146121005_i32 : i32 to vector<24x256xi32>
    %18 = arith.muli %16, %17 : vector<24x256xi32>
    %c15_i32 = arith.constant 15 : i32
    %19 = vector.broadcast %c15_i32 : i32 to vector<24x256xi32>
    %20 = arith.shrui %18, %19 : vector<24x256xi32>
    %21 = arith.xori %18, %20 : vector<24x256xi32>
    %c-2073254261_i32 = arith.constant -2073254261 : i32
    %22 = vector.broadcast %c-2073254261_i32 : i32 to vector<24x256xi32>
    %23 = arith.muli %21, %22 : vector<24x256xi32>
    %c16_i32_2 = arith.constant 16 : i32
    %24 = vector.broadcast %c16_i32_2 : i32 to vector<24x256xi32>
    %25 = arith.shrui %23, %24 : vector<24x256xi32>
    %26 = arith.xori %23, %25 : vector<24x256xi32>
    %c-2147483648_i32 = arith.constant -2147483648 : i32
    %27 = vector.broadcast %c-2147483648_i32 : i32 to vector<24x256xi32>
    %28 = arith.cmpi uge, %26, %27 : vector<24x256xi32>
    %cst = arith.constant 2.000000e+00 : f32
    %29 = vector.broadcast %cst : f32 to vector<24x256xf32>
    %30 = arith.mulf %1, %29 : vector<24x256xf32>
    %cst_3 = arith.constant 0.000000e+00 : f32
    %31 = vector.broadcast %cst_3 : f32 to vector<24x256xf32>
    %32 = arith.select %28, %30, %31 : vector<24x256xi1>, vector<24x256xf32>
    %33 = arith.truncf %32 : vector<24x256xf32> to vector<24x256xbf16>
    %c0_4 = arith.constant 0 : index
    %c0_5 = arith.constant 0 : index
    %34 = vector.load %arg3[%c0_4, %c0_5] : memref<256x64xbf16, #tpu.memory_space<vmem>>, vector<256x64xbf16>
    %cst_6 = arith.constant dense<0.000000e+00> : vector<24x64xf32>
    %35 = tpu.matmul %33, %34, %cst_6 {dimension_numbers = #tpu.dot_dimension_numbers<[1], [0], [0], [1], [0, 0, 1, 1], [], []>} : vector<24x256xbf16>, vector<256x64xbf16>, vector<24x64xf32> -> vector<24x64xf32>
    %c0_7 = arith.constant 0 : index
    %c0_8 = arith.constant 0 : index
    %36 = vector.load %arg4[%c0_7, %c0_8] : memref<1x64xf32, #tpu.memory_space<vmem>>, vector<1x64xf32>
    %37 = vector.broadcast %36 : vector<1x64xf32> to vector<24x64xf32>
    %38 = arith.addf %35, %37 : vector<24x64xf32>
    %cst_9 = arith.constant 0.000000e+00 : f32
    %39 = vector.broadcast %cst_9 : f32 to vector<24x64xf32>
    %40 = arith.cmpf ogt, %38, %39 : vector<24x64xf32>
    %41 = math.exp %38 : vector<24x64xf32>
    %cst_10 = arith.constant 1.000000e+00 : f32
    %42 = vector.broadcast %cst_10 : f32 to vector<24x64xf32>
    %43 = arith.subf %41, %42 : vector<24x64xf32>
    %44 = arith.select %40, %38, %43 : vector<24x64xi1>, vector<24x64xf32>
    %45 = arith.truncf %44 : vector<24x64xf32> to vector<24x64xbf16>
    %c0_11 = arith.constant 0 : index
    %c0_12 = arith.constant 0 : index
    %46 = vector.load %arg5[%c0_11, %c0_12] : memref<64x64xbf16, #tpu.memory_space<vmem>>, vector<64x64xbf16>
    %cst_13 = arith.constant dense<0.000000e+00> : vector<24x64xf32>
    %47 = tpu.matmul %45, %46, %cst_13 {dimension_numbers = #tpu.dot_dimension_numbers<[1], [0], [0], [1], [0, 0, 1, 1], [], []>} : vector<24x64xbf16>, vector<64x64xbf16>, vector<24x64xf32> -> vector<24x64xf32>
    %c0_14 = arith.constant 0 : index
    %c0_15 = arith.constant 0 : index
    %48 = vector.load %arg6[%c0_14, %c0_15] : memref<1x64xf32, #tpu.memory_space<vmem>>, vector<1x64xf32>
    %49 = vector.broadcast %48 : vector<1x64xf32> to vector<24x64xf32>
    %50 = arith.addf %47, %49 : vector<24x64xf32>
    %cst_16 = arith.constant 0.000000e+00 : f32
    %51 = vector.broadcast %cst_16 : f32 to vector<24x64xf32>
    %52 = arith.maximumf %50, %51 : vector<24x64xf32>
    %53 = arith.truncf %52 : vector<24x64xf32> to vector<24x64xbf16>
    %c0_17 = arith.constant 0 : index
    %c0_18 = arith.constant 0 : index
    %54 = vector.load %arg7[%c0_17, %c0_18] : memref<64x64xbf16, #tpu.memory_space<vmem>>, vector<64x64xbf16>
    %cst_19 = arith.constant dense<0.000000e+00> : vector<24x64xf32>
    %55 = tpu.matmul %53, %54, %cst_19 {dimension_numbers = #tpu.dot_dimension_numbers<[1], [0], [0], [1], [0, 0, 1, 1], [], []>} : vector<24x64xbf16>, vector<64x64xbf16>, vector<24x64xf32> -> vector<24x64xf32>
    %c0_20 = arith.constant 0 : index
    %c0_21 = arith.constant 0 : index
    %56 = vector.load %arg8[%c0_20, %c0_21] : memref<1x64xf32, #tpu.memory_space<vmem>>, vector<1x64xf32>
    %57 = vector.broadcast %56 : vector<1x64xf32> to vector<24x64xf32>
    %58 = arith.addf %55, %57 : vector<24x64xf32>
    %cst_22 = arith.constant 0.000000e+00 : f32
    %59 = vector.broadcast %cst_22 : f32 to vector<24x64xf32>
    %60 = arith.maximumf %58, %59 : vector<24x64xf32>
    %61 = arith.truncf %60 : vector<24x64xf32> to vector<24x64xbf16>
    %c0_23 = arith.constant 0 : index
    %c0_24 = arith.constant 0 : index
    %62 = vector.load %arg9[%c0_23, %c0_24] : memref<64x64xbf16, #tpu.memory_space<vmem>>, vector<64x64xbf16>
    %cst_25 = arith.constant dense<0.000000e+00> : vector<24x64xf32>
    %63 = tpu.matmul %61, %62, %cst_25 {dimension_numbers = #tpu.dot_dimension_numbers<[1], [0], [0], [1], [0, 0, 1, 1], [], []>} : vector<24x64xbf16>, vector<64x64xbf16>, vector<24x64xf32> -> vector<24x64xf32>
    %c0_26 = arith.constant 0 : index
    %c0_27 = arith.constant 0 : index
    %64 = vector.load %arg10[%c0_26, %c0_27] : memref<1x64xf32, #tpu.memory_space<vmem>>, vector<1x64xf32>
    %65 = vector.broadcast %64 : vector<1x64xf32> to vector<24x64xf32>
    %66 = arith.addf %63, %65 : vector<24x64xf32>
    %cst_28 = arith.constant 0.000000e+00 : f32
    %67 = vector.broadcast %cst_28 : f32 to vector<24x64xf32>
    %68 = arith.maximumf %66, %67 : vector<24x64xf32>
    %69 = arith.truncf %68 : vector<24x64xf32> to vector<24x64xbf16>
    %c0_29 = arith.constant 0 : index
    %c0_30 = arith.constant 0 : index
    %70 = vector.load %arg11[%c0_29, %c0_30] : memref<64x128xbf16, #tpu.memory_space<vmem>>, vector<64x128xbf16>
    %cst_31 = arith.constant dense<0.000000e+00> : vector<24x128xf32>
    %71 = tpu.matmul %69, %70, %cst_31 {dimension_numbers = #tpu.dot_dimension_numbers<[1], [0], [0], [1], [0, 0, 1, 1], [], []>} : vector<24x64xbf16>, vector<64x128xbf16>, vector<24x128xf32> -> vector<24x128xf32>
    %c0_32 = arith.constant 0 : index
    %c0_33 = arith.constant 0 : index
    %72 = vector.load %arg12[%c0_32, %c0_33] : memref<24x128xf32, #tpu.memory_space<vmem>>, vector<24x128xf32>
    tpu.vector_store %arg12[%c0_32, %c0_33], %71 {strides = array<i32>} : memref<24x128xf32, #tpu.memory_space<vmem>>, vector<24x128xf32>,
    return
  }
  func.func @transform_0(%arg0: i32, %arg1: memref<1xi32, #tpu.memory_space<smem>>) -> (i32, i32) {
    %c0_i32 = arith.constant 0 : i32
    %c0_i32_0 = arith.constant 0 : i32
    return %arg0, %c0_i32 : i32, i32
  }
  func.func @transform_1(%arg0: i32, %arg1: memref<1xi32, #tpu.memory_space<smem>>) -> (i32, i32) {
    %c0_i32 = arith.constant 0 : i32
    %c0_i32_0 = arith.constant 0 : i32
    %c0_i32_1 = arith.constant 0 : i32
    return %c0_i32, %c0_i32_0 : i32, i32
  }
  func.func @transform_2(%arg0: i32, %arg1: memref<1xi32, #tpu.memory_space<smem>>) -> (i32, i32) {
    %c0_i32 = arith.constant 0 : i32
    %c0_i32_0 = arith.constant 0 : i32
    %c0_i32_1 = arith.constant 0 : i32
    return %c0_i32, %c0_i32_0 : i32, i32
  }
  func.func @transform_3(%arg0: i32, %arg1: memref<1xi32, #tpu.memory_space<smem>>) -> (i32, i32) {
    %c0_i32 = arith.constant 0 : i32
    %c0_i32_0 = arith.constant 0 : i32
    %c0_i32_1 = arith.constant 0 : i32
    return %c0_i32, %c0_i32_0 : i32, i32
  }
  func.func @transform_4(%arg0: i32, %arg1: memref<1xi32, #tpu.memory_space<smem>>) -> (i32, i32) {
    %c0_i32 = arith.constant 0 : i32
    %c0_i32_0 = arith.constant 0 : i32
    %c0_i32_1 = arith.constant 0 : i32
    return %c0_i32, %c0_i32_0 : i32, i32
  }
  func.func @transform_5(%arg0: i32, %arg1: memref<1xi32, #tpu.memory_space<smem>>) -> (i32, i32) {
    %c0_i32 = arith.constant 0 : i32
    %c0_i32_0 = arith.constant 0 : i32
    %c0_i32_1 = arith.constant 0 : i32
    return %c0_i32, %c0_i32_0 : i32, i32
  }
  func.func @transform_6(%arg0: i32, %arg1: memref<1xi32, #tpu.memory_space<smem>>) -> (i32, i32) {
    %c0_i32 = arith.constant 0 : i32
    %c0_i32_0 = arith.constant 0 : i32
    %c0_i32_1 = arith.constant 0 : i32
    return %c0_i32, %c0_i32_0 : i32, i32
  }
  func.func @transform_7(%arg0: i32, %arg1: memref<1xi32, #tpu.memory_space<smem>>) -> (i32, i32) {
    %c0_i32 = arith.constant 0 : i32
    %c0_i32_0 = arith.constant 0 : i32
    %c0_i32_1 = arith.constant 0 : i32
    return %c0_i32, %c0_i32_0 : i32, i32
  }
  func.func @transform_8(%arg0: i32, %arg1: memref<1xi32, #tpu.memory_space<smem>>) -> (i32, i32) {
    %c0_i32 = arith.constant 0 : i32
    %c0_i32_0 = arith.constant 0 : i32
    %c0_i32_1 = arith.constant 0 : i32
    return %c0_i32, %c0_i32_0 : i32, i32
  }
  func.func @transform_9(%arg0: i32, %arg1: memref<1xi32, #tpu.memory_space<smem>>) -> (i32, i32) {
    %c0_i32 = arith.constant 0 : i32
    %c0_i32_0 = arith.constant 0 : i32
    %c0_i32_1 = arith.constant 0 : i32
    return %c0_i32, %c0_i32_0 : i32, i32
  }
  func.func @transform_10(%arg0: i32, %arg1: memref<1xi32, #tpu.memory_space<smem>>) -> (i32, i32) {
    %c0_i32 = arith.constant 0 : i32
    %c0_i32_0 = arith.constant 0 : i32
    return %arg0, %c0_i32 : i32, i32
  }
}

</mosaic_0001>

<bundles_post_ra>
// kernel: tpu_custom_call.1
= control target key start
LH: loop header
LB: loop body
LE: loop exit
PB: predicated region body
PF: predicated region fallthrough
CT: control target
= control target key end

     0   :  { %v50_v1 = vlaneseq  ;;  %s1174_s0 = inlined_call_operand.<no memory space> [shape: s32[1], index: 0, kind: input, shape index: {}]   ;;  %s1175_s1 = inlined_call_operand.vmem [shape: bf16[24,256], index: 1, kind: input, shape index: {}]   ;;  %s1176_s2 = inlined_call_operand.vmem [shape: bf16[256,64], index: 2, kind: input, shape index: {}]   ;;  %s1177_s3 = inlined_call_operand.vmem [shape: f32[1,64], index: 3, kind: input, shape index: {}]   ;;  %s1178_s4 = inlined_call_operand.vmem [shape: bf16[64,64], index: 4, kind: input, shape index: {}]   ;;  %s1179_s5 = inlined_call_operand.vmem [shape: f32[1,64], index: 5, kind: input, shape index: {}]   ;;  %s1180_s6 = inlined_call_operand.vmem [shape: bf16[64,64], index: 6, kind: input, shape index: {}]   ;;  %s1181_s7 = inlined_call_operand.vmem [shape: f32[1,64], index: 7, kind: input, shape index: {}]   ;;  %s1182_s8 = inlined_call_operand.vmem [shape: bf16[64,64], index: 8, kind: input, shape index: {}]   ;;  %s1183_s9 = inlined_call_operand.vmem [shape: f32[1,64], index: 9, kind: input, shape index: {}]   ;;  %s1184_s10 = inlined_call_operand.vmem [shape: bf16[64,128], index: 10, kind: input, shape index: {}]   ;;  %s1185_s11 = inlined_call_operand.hbm [shape: f32[24,128], index: 11, kind: output, shape index: {}]  }
   0x1   :  { %v910_v0 = vld [vmem:[%s1176_s2 + $0x78] sm:$0xff]   ;;  %v912_v3 = vld [vmem:[%s1176_s2 + $0x70] sm:$0xff]   ;;  %v914_v6 = vld [vmem:[%s1176_s2 + $0x68] sm:$0xff]   ;;  %s70_s24 = smul.u32 2654435769, %s1174_s0 }
   0x2   :  { %v911_v2 = vld [vmem:[%s1176_s2 + $0x38] sm:$0xff]   ;;  %807 = vmatprep.subr.bf16.mxu0 %v910_v0  ;;  %v913_v4 = vld [vmem:[%s1176_s2 + $0x30] sm:$0xff]   ;;  %v51_v5 = vshrl.u32 %v50_v1, 7  ;;  %v59_v7 = vand.u32 127, %v50_v1  ;;  %v915_v8 = vld [vmem:[%s1176_s2 + $0x28] sm:$0xff]  }
   0x3   :  { %808 = vmatpush3.bf16.msra.mxu0 %v911_v2  ;;  %v916_v10 = vld [vmem:[%s1176_s2 + $0x60] sm:$0xff]   ;;  %v918_v16 = vld [vmem:[%s1176_s2 + $0x58] sm:$0xff]   ;;  %v920_v21 = vld [vmem:[%s1176_s2 + $0x50] sm:$0xff]   ;;  %v71_v27 = vstv %s70_s24 }
   0x4   :  { %809 = vmatprep.subr.bf16.mxu0 %v912_v3  ;;  %v52_v9 = vadd.s32 8, %v51_v5  ;;  %v53_v11 = vadd.s32 16, %v51_v5  ;;  %v60_v12 = vadd.s32 128, %v59_v7  ;;  %v61_v13 = vmul.u32 256, %v51_v5  ;;  %v917_v14 = vld [vmem:[%s1176_s2 + $0x20] sm:$0xff]   ;;  %v919_v18 = vld [vmem:[%s1176_s2 + $0x18] sm:$0xff]  }
   0x5   :  { %v39_v22 = vld [vmem:[%s1175_s1] sm:$0xff]  ;;  %v921_v25 = vld [vmem:[%s1176_s2 + $0x10] sm:$0xff]   ;;  %v40_v28 = vld [vmem:[%s1175_s1 + $0x8] sm:$0xff] }
   0x6   :  { %v62_v15 = vmul.u32 256, %v52_v9  ;;  %v63_v17 = vmul.u32 256, %v53_v11  ;;  %v65_v19 = vadd.s32 %v61_v13, %v60_v12  ;;  %v64_v23 = vadd.s32 %v61_v13, %v59_v7  ;;  %v922_v32 = vld [vmem:[%s1176_s2 + $0x48] sm:$0xff]   ;;  %v924_v41 = vld [vmem:[%s1176_s2 + $0x40] sm:$0xff]   ;;  %v1094_v52 = vld [vmem:[%s1175_s1 + $0x10] sm:$0xff] }
   0x7   :  { %810 = vmatpush3.bf16.msra.mxu0 %v913_v4  ;;  %v42_v29 = vunpack.c.l.bf16 %v39_v22  ;;  %v43_v33 = vunpack.c.h.bf16 %v39_v22  ;;  %v923_v37 = vld [vmem:[%s1176_s2 + $0x8] sm:$0xff]   ;;  %v44_v42 = vunpack.c.l.bf16 %v40_v28  ;;  %v925_v54 = vld [vmem:[%s1176_s2] sm:$0xff]   ;;  %v45_v55 = vunpack.c.h.bf16 %v40_v28 }
   0x8   :  { %811 = vmatprep.subr.bf16.mxu0 %v914_v6  ;;  %v67_v20 = vadd.s32 %v62_v15, %v60_v12  ;;  %v66_v24 = vadd.s32 %v62_v15, %v59_v7  ;;  %v69_v26 = vadd.s32 %v63_v17, %v60_v12  ;;  %v73_v30 = vxor.u32 %v71_v27, %v65_v19 }
   0x9   :  { %v72_v34 = vxor.u32 %v71_v27, %v64_v23  ;;  %v68_v36 = vadd.s32 %v63_v17, %v59_v7  ;;  %v1087_v47 = vmul.f32 2.0, %v42_v29  ;;  %v1089_v49 = vmul.f32 2.0, %v43_v33 }
   0xa   :  { %v75_v31 = vxor.u32 %v71_v27, %v67_v20  ;;  %v74_v35 = vxor.u32 %v71_v27, %v66_v24  ;;  %v79_v38 = vshrl.u32 %v73_v30, 16  ;;  %v77_v40 = vxor.u32 %v71_v27, %v69_v26 }
   0xb   :  { %812 = vmatpush3.bf16.msra.mxu0 %v915_v8  ;;  %v78_v43 = vshrl.u32 %v72_v34, 16  ;;  %v76_v53 = vxor.u32 %v71_v27, %v68_v36  ;;  %v134_v59 = vmul.f32 2.0, %v44_v42  ;;  %v47_v4 = vunpack.c.h.bf16 %v1094_v52 }
   0xc   :  { %813 = vmatprep.subr.bf16.mxu0 %v916_v10  ;;  %v81_v39 = vshrl.u32 %v75_v31, 16  ;;  %v80_v44 = vshrl.u32 %v74_v35, 16  ;;  %v85_v45 = vxor.u32 %v79_v38, %v73_v30  ;;  %v83_v48 = vshrl.u32 %v77_v40, 16 }
   0xd   :  { %v84_v50 = vxor.u32 %v78_v43, %v72_v34  ;;  %v82_v62 = vshrl.u32 %v76_v53, 16  ;;  %v135_v8 = vmul.f32 2.0, %v45_v55  ;;  %v769_v33 = vpack.c.bf16 %v134_v59, %v1087_v47 }
   0xe   :  { %v87_v46 = vxor.u32 %v81_v39, %v75_v31  ;;  %v86_v51 = vxor.u32 %v80_v44, %v74_v35  ;;  %v91_v56 = vmul.u32 2146121005, %v85_v45  ;;  %v89_v58 = vxor.u32 %v83_v48, %v77_v40 }
   0xf   :  { %814 = vmatpush3.bf16.msra.mxu0 %v917_v14  ;;  %v90_v60 = vmul.u32 2146121005, %v84_v50  ;;  %v88_v5 = vxor.u32 %v82_v62, %v76_v53  ;;  %v766_v29 = vpack.c.bf16 %v135_v8, %v1089_v49 }
  0x10   :  { %815 = vmatprep.subr.bf16.mxu0 %v918_v16  ;;  %v93_v57 = vmul.u32 2146121005, %v87_v46  ;;  %v92_v61 = vmul.u32 2146121005, %v86_v51  ;;  %v97_v63 = vshrl.u32 %v91_v56, 15 }
  0x11   :  { %v95_v1 = vmul.u32 2146121005, %v89_v58  ;;  %v96_v2 = vshrl.u32 %v90_v60, 15  ;;  %v94_v12 = vmul.u32 2146121005, %v88_v5 }
  0x12   :  { %v99_v0 = vshrl.u32 %v93_v57, 15  ;;  %v98_v3 = vshrl.u32 %v92_v61, 15  ;;  %v103_v6 = vxor.u32 %v97_v63, %v91_v56 }
  0x13   :  { %816 = vmatpush3.bf16.msra.mxu0 %v919_v18  ;;  %v101_v9 = vshrl.u32 %v95_v1, 15  ;;  %v102_v10 = vxor.u32 %v96_v2, %v90_v60  ;;  %v137_v18 = vmul.f32 2.0, %v47_v4  ;;  %v100_v19 = vshrl.u32 %v94_v12, 15 }
  0x14   :  { %817 = vmatprep.subr.bf16.mxu0 %v920_v21  ;;  %v105_v7 = vxor.u32 %v99_v0, %v93_v57  ;;  %v104_v11 = vxor.u32 %v98_v3, %v92_v61  ;;  %v109_v13 = vmul.u32 2221713035, %v103_v6 }
  0x15   :  { %v107_v15 = vxor.u32 %v101_v9, %v95_v1  ;;  %v108_v16 = vmul.u32 2221713035, %v102_v10  ;;  %v106_v26 = vxor.u32 %v100_v19, %v94_v12 }
  0x16   :  { %v111_v14 = vmul.u32 2221713035, %v105_v7  ;;  %v110_v17 = vmul.u32 2221713035, %v104_v11  ;;  %v115_v20 = vshrl.u32 %v109_v13, 16 }
  0x17   :  { %818 = vmatpush3.bf16.msra.mxu0 %v921_v25  ;;  %v113_v22 = vmul.u32 2221713035, %v107_v15  ;;  %v114_v23 = vshrl.u32 %v108_v16, 16  ;;  %v46_v25 = vunpack.c.l.bf16 %v1094_v52  ;;  %v112_v34 = vmul.u32 2221713035, %v106_v26 }
  0x18   :  { %819 = vmatprep.subr.bf16.mxu0 %v922_v32  ;;  %v117_v21 = vshrl.u32 %v111_v14, 16  ;;  %v116_v24 = vshrl.u32 %v110_v17, 16  ;;  %v121_v27 = vxor.u32 %v115_v20, %v109_v13 }
  0x19   :  { %v119_v30 = vshrl.u32 %v113_v22, 16  ;;  %v120_v31 = vxor.u32 %v114_v23, %v108_v16 }
  0x1a   :  { %v123_v28 = vxor.u32 %v117_v21, %v111_v14  ;;  %v122_v32 = vxor.u32 %v116_v24, %v110_v17 }
  0x1b   :  { %820 = vmatpush3.bf16.msra.mxu0 %v923_v37 }
  0x1c   :  { %821 = vmatprep.subr.bf16.mxu0 %v924_v41 }
  0x1f   :  { %822 = vmatpush3.bf16.msra.mxu0 %v925_v54 }
  0x20   :  { %17 = vsyncpa [#allocation5], 0  ;;  %vm127_vm0 = vcmp.ge.u32.totalorder %v121_v27, 2147483648  ;;  %vm129_vm1 = vcmp.ge.u32.totalorder %v123_v28, 2147483648  ;;  %v125_v35 = vxor.u32 %v119_v30, %v113_v22  ;;  %v772_v36 = vpack.c.bf16 %v137_v18, %v137_v18  ;;  %v926_v41 = vld [vmem:[%s1178_s4 + $0x18] sm:$0xff]   ;;  %v927_v42 = vld [vmem:[%s1178_s4 + $0x10] sm:$0xff]  }
  0x21   :  { %vm765_vm2 = vmpackc.low %vm129_vm1, %vm127_vm0  ;;  %vm126_vm3 = vcmp.ge.u32.totalorder %v120_v31, 2147483648  ;;  %vm128_vm4 = vcmp.ge.u32.totalorder %v122_v32, 2147483648  ;;  %v118_v37 = vshrl.u32 %v112_v34, 16  ;;  %v136_v39 = vmul.f32 2.0, %v46_v25  ;;  %859 = vmatprep.subr.bf16.mxu1 %v926_v41  ;;  %v928_v43 = vld [vmem:[%s1178_s4 + $0x8] sm:$0xff]   ;;  %v929_v44 = vld [vmem:[%s1178_s4] sm:$0xff]  }
  0x22   :  { %767 = vmatprep.mubr.msk.bf16.mxu0 %vm765_vm2, %v766_v29  ;;  %vm768_vm5 = vmpackc.low %vm128_vm4, %vm126_vm3  ;;  %vm131_vm6 = vcmp.ge.u32.totalorder %v125_v35, 2147483648  ;;  %860 = vmatpush3.bf16.msra.mxu1 %v926_v41  ;;  %v930_v45 = vld [vmem:[%s1180_s6 + $0x18] sm:$0xff]   ;;  %v748_v47 = vld [vmem:[%s1177_s3] ss:$0 sm:$0xff]  ;;  %vm387_vm12 = vcmask 523264  }
  0x23   :  { %770 = vmatmul.mubr.msk.bf16.vlgmr.msra.gmra.mxu0 %vm768_vm5, %v769_v33  ;;  %vm771_vm7 = vmpackc.low %vm131_vm6, %vm131_vm6  ;;  %v124_v38 = vxor.u32 %v118_v37, %v112_v34  ;;  %v775_v40 = vpack.c.bf16 %v136_v39, %v136_v39  ;;  %861 = vmatprep.subr.bf16.mxu1 %v927_v42  ;;  %v931_v11 = vld [vmem:[%s1180_s6 + $0x10] sm:$0xff]   ;;  %v932_v12 = vld [vmem:[%s1180_s6 + $0x8] sm:$0xff]  }
  0x24   :  { %773 = vmatprep.mubr.msk.bf16.mxu0 %vm771_vm7, %v772_v36  ;;  %v933_v13 = vld [vmem:[%s1180_s6] sm:$0xff]   ;;  %v934_v14 = vld [vmem:[%s1182_s8 + $0x18] sm:$0xff]   ;;  %v935_v28 = vld [vmem:[%s1182_s8 + $0x10] sm:$0xff]  }
  0x25   :  { %vm130_vm8 = vcmp.ge.u32.totalorder %v124_v38, 2147483648  ;;  %883 = vmatprep.subr.bf16.mxu0 %v934_v14  ;;  %v780_v16 = vld [vmem:[%s1179_s5] ss:$0 sm:$0xff]  ;;  %v936_v29 = vld [vmem:[%s1182_s8 + $0x8] sm:$0xff]   ;;  %v938_v31 = vld [vmem:[%s1184_s10 + $0x18] sm:$0xff]  }
  0x26   :  { %vm774_vm9 = vmpackc.low %vm130_vm8, %vm130_vm8  ;;  %862 = vmatpush3.bf16.msra.mxu1 %v927_v42  ;;  %884 = vmatpush3.bf16.msra.mxu0 %v934_v14  ;;  %v937_v30 = vld [vmem:[%s1182_s8] sm:$0xff]  }
  0x27   :  { %863 = vmatprep.subr.bf16.mxu1 %v928_v43  ;;  %885 = vmatprep.subr.bf16.mxu0 %v935_v28  ;;  %v787_v33 = vld [vmem:[%s1181_s7] ss:$0 sm:$0xff] }
  0x2a   :  { %864 = vmatpush3.bf16.msra.mxu1 %v928_v43  ;;  %886 = vmatpush3.bf16.msra.mxu0 %v935_v28 }
  0x2b   :  { %776 = vmatmul.mubr.msk.bf16.gmra.mxu0 %vm774_vm9, %v775_v40  ;;  %865 = vmatprep.subr.bf16.mxu1 %v929_v44 }
  0x2c   :  { %887 = vmatprep.subr.bf16.mxu0 %v936_v29 }
  0x2e   :  { %866 = vmatpush3.bf16.msra.mxu1 %v929_v44  ;;  %888 = vmatpush3.bf16.msra.mxu0 %v936_v29 }
  0x2f   :  { %871 = vmatprep.subr.bf16.mxu1 %v930_v45  ;;  %889 = vmatprep.subr.bf16.mxu0 %v937_v30 }
  0x32   :  { %890 = vmatpush3.bf16.msra.mxu0 %v937_v30 }
  0xe3   :  { %v823_v46 = vpop.f32.mrf.mxu0 }
  0xe5   :  { %v824_v48 = vpop.f32.mrf.mxu0 }
  0xe6   :  { %v825_v49 = vadd.f32 %v824_v48, %v823_v46  ;;  %v940_v46 = vld [vmem:[%s1184_s10 + $0x8] sm:$0xff]  }
  0xe7   :  { %v826_v50 = vpop.f32.mrf.mxu0 }
  0xe8   :  { %v318_v51 = vadd.f32 %v825_v49, %v748_v47  ;;  %v794_v49 = vld [vmem:[%s1183_s9] ss:$0 sm:$0xff] }
  0xe9   :  { %v827_v52 = vpop.f32.mrf.mxu0 }
  0xea   :  { %v334_v53 = vmul.f32 1.442695, %v318_v51  ;;  %v828_v54 = vadd.f32 %v827_v52, %v826_v50  ;;  %vm331_vm10 = vcmp.gt.f32.partialorder %v318_v51, 0.0 }
  0xeb   :  { %v829_v55 = vpop.f32.mrf.mxu0 }
  0xec   :  { %942 = vpow2.f32 %v334_v53  ;;  %v321_v56 = vadd.f32 %v828_v54, %v748_v47 }
  0xed   :  { %v830_v57 = vpop.f32.mrf.mxu0 }
  0xee   :  { %v336_v58 = vmul.f32 1.442695, %v321_v56  ;;  %v831_v59 = vadd.f32 %v830_v57, %v829_v55  ;;  %vm332_vm11 = vcmp.gt.f32.partialorder %v321_v56, 0.0 }
  0xef   :  { %v832_v60 = vpop.f32.mrf.mxu0 }
  0xf0   :  { %944 = vpow2.f32 %v336_v58  ;;  %v326_v61 = vadd.f32 %v831_v59, %v748_v47  ;;  %v941_v47 = vld [vmem:[%s1184_s10] sm:$0xff]  }
  0xf1   :  { %v833_v62 = vpop.f32.mrf.mxu0 }
  0xf2   :  { %v338_v63 = vmul.f32 1.442695, %v326_v61  ;;  %vm333_vm13 = vcmp.gt.f32.partialorder %v326_v61, 0.0 }
  0xf4   :  { %946 = vpow2.f32 %v338_v63 }
  0xf9   :  { %v943_v0 = vpop.eup %942 }
  0xfa   :  { %v777_v1 = vadd.f32 -1.0, %v943_v0 }
  0xfc   :  { %v343_v4 = vsel %vm331_vm10, %v318_v51, %v777_v1 }
  0xfd   :  { %v945_v2 = vpop.eup %944 }
  0xfe   :  { %v778_v3 = vadd.f32 -1.0, %v945_v2 }
 0x100   :  { %v344_v5 = vsel %vm332_vm11, %v321_v56, %v778_v3 }
 0x101   :  { %v947_v6 = vpop.eup %946  ;;  %v346_v7 = vpack.c.bf16 %v344_v5, %v343_v4 }
 0x102   :  { %v779_v8 = vadd.f32 -1.0, %v947_v6 }
 0x103   :  { %867 = vmatprep.mubr.msk.bf16.mxu1 %vm387_vm12, %v346_v7 }
 0x104   :  { %v345_v9 = vsel %vm333_vm13, %v326_v61, %v779_v8 }
 0x105   :  { %v347_v10 = vpack.c.bf16 %v345_v9, %v345_v9 }
 0x107   :  { %868 = vmatmul.mubr.msk.bf16.vlgmr.msra.gmra.mxu1 %vm387_vm12, %v347_v10 }
 0x108   :  { %872 = vmatpush3.bf16.msra.mxu1 %v930_v45  ;;  %v939_v45 = vld [vmem:[%s1184_s10 + $0x10] sm:$0xff]   ;;  %s970_s10 = smov [#allocation4]  }
 0x109   :  { %873 = vmatprep.subr.bf16.mxu1 %v931_v11  ;;  %s737_s3 = sshll.u32 %s970_s10, 4  ;;  %s738_s3 = int_to_ptr.vmem [resolvable:$true] %s737_s3 }
 0x10a   :  { %s948_s9 = scalar_lea.vmem %s738_s3, 384  ;;  %p953_p1 = scmp.lt.s32.totalorder %s738_s3, %s738_s3 }
 0x10b   :  { %p949_p0 = scmp.ne.s32.totalorder %s738_s3, %s948_s9  ;;  %p954_p2 = scmp.lt.s32.totalorder %s948_s9, %s948_s9 }
 0x10c   :  { %874 = vmatpush3.bf16.msra.mxu1 %v931_v11 }
 0x10d   :  { %875 = vmatprep.subr.bf16.mxu1 %v932_v12  ;;  %p955_p3 = por %p954_p2, %p953_p1 }
 0x10f   :  { %p956_p4 = pnand %p955_p3, %p949_p0 }
 0x110   :  { %876 = vmatpush3.bf16.msra.mxu1 %v932_v12 }
 0x111   :  { %877 = vmatprep.subr.bf16.mxu1 %v933_v13 }
 0x114   :  { %878 = vmatpush3.bf16.msra.mxu1 %v933_v13 }
 0x115   :  { %895 = vmatprep.subr.bf16.mxu1 %v938_v31 }
 0x1c7   :  { %v869_v15 = vpop.f32.mrf.mxu1 }
 0x1c8   :  { %v437_v18 = vadd.f32 %v869_v15, %v780_v16 }
 0x1c9   :  { %v428_v17 = vpop.f32.mrf.mxu1 }
 0x1ca   :  { %v429_v20 = vadd.f32 %v780_v16, %v428_v17  ;;  %v444_v23 = vmax.f32 %v437_v18, 0.0 }
 0x1cb   :  { %v870_v19 = vpop.f32.mrf.mxu1 }
 0x1cc   :  { %v442_v24 = vmax.f32 %v429_v20, 0.0  ;;  %v446_v27 = vpack.c.bf16 %v444_v23, %v444_v23 }
 0x1cd   :  { %v431_v21 = vpop.f32.mrf.mxu1 }
 0x1ce   :  { %v432_v22 = vadd.f32 %v780_v16, %v431_v21 }
 0x1d0   :  { %v443_v25 = vmax.f32 %v432_v22, 0.0 }
 0x1d2   :  { %v445_v26 = vpack.c.bf16 %v443_v25, %v442_v24 }
 0x1d4   :  { %879 = vmatprep.mubr.msk.bf16.mxu1 %vm387_vm12, %v445_v26 }
 0x1d5   :  { %880 = vmatmul.mubr.msk.bf16.vlgmr.msra.gmra.mxu1 %vm387_vm12, %v446_v27 }
 0x1d6   :  { %896 = vmatpush3.bf16.msra.mxu1 %v938_v31 }
 0x1d7   :  { %897 = vmatprep.subr.bf16.mxu1 %v939_v45 }
 0x1da   :  { %898 = vmatpush3.bf16.msra.mxu1 %v939_v45 }
 0x1db   :  { %899 = vmatprep.subr.bf16.mxu1 %v940_v46 }
 0x1de   :  { %900 = vmatpush3.bf16.msra.mxu1 %v940_v46 }
 0x1df   :  { %901 = vmatprep.subr.bf16.mxu1 %v941_v47 }
 0x1e2   :  { %902 = vmatpush3.bf16.msra.mxu1 %v941_v47 }
 0x295   :  { %v881_v32 = vpop.f32.mrf.mxu1 }
 0x296   :  { %v535_v35 = vadd.f32 %v881_v32, %v787_v33 }
 0x297   :  { %v526_v34 = vpop.f32.mrf.mxu1 }
 0x298   :  { %v527_v37 = vadd.f32 %v787_v33, %v526_v34  ;;  %v542_v40 = vmax.f32 %v535_v35, 0.0 }
 0x299   :  { %v882_v36 = vpop.f32.mrf.mxu1 }
 0x29a   :  { %v540_v41 = vmax.f32 %v527_v37, 0.0  ;;  %v544_v44 = vpack.c.bf16 %v542_v40, %v542_v40 }
 0x29b   :  { %v529_v38 = vpop.f32.mrf.mxu1 }
 0x29c   :  { %v530_v39 = vadd.f32 %v787_v33, %v529_v38 }
 0x29e   :  { %v541_v42 = vmax.f32 %v530_v39, 0.0 }
 0x2a0   :  { %v543_v43 = vpack.c.bf16 %v541_v42, %v540_v41 }
 0x2a2   :  { %891 = vmatprep.mubr.msk.bf16.mxu0 %vm387_vm12, %v543_v43 }
 0x2a3   :  { %892 = vmatmul.mubr.msk.bf16.vlgmr.msra.gmra.mxu0 %vm387_vm12, %v544_v44 }
 0x363   :  { %v893_v48 = vpop.f32.mrf.mxu0 }
 0x364   :  { %v633_v51 = vadd.f32 %v893_v48, %v794_v49 }
 0x365   :  { %v624_v50 = vpop.f32.mrf.mxu0 }
 0x366   :  { %v625_v53 = vadd.f32 %v794_v49, %v624_v50  ;;  %v640_v56 = vmax.f32 %v633_v51, 0.0 }
 0x367   :  { %v894_v52 = vpop.f32.mrf.mxu0 }
 0x368   :  { %v638_v57 = vmax.f32 %v625_v53, 0.0  ;;  %v642_v60 = vpack.c.bf16 %v640_v56, %v640_v56 }
 0x369   :  { %v627_v54 = vpop.f32.mrf.mxu0 }
 0x36a   :  { %v628_v55 = vadd.f32 %v794_v49, %v627_v54 }
 0x36c   :  { %v639_v58 = vmax.f32 %v628_v55, 0.0 }
 0x36e   :  { %v641_v59 = vpack.c.bf16 %v639_v58, %v638_v57 }
 0x370   :  { %903 = vmatprep.mubr.msk.bf16.mxu1 %vm387_vm12, %v641_v59 }
 0x371   :  { %904 = vmatmul.mubr.msk.bf16.vlgmr.msra.gmra.mxu1 %vm387_vm12, %v642_v60 }
 0x431   :  { %v905_v61 = vpop.f32.mrf.mxu1 }
 0x432   :  { %731 = vst [vmem:[#allocation4 + $0x10] sm:$0xff] %v905_v61 }
 0x433   :  { %v715_v62 = vpop.f32.mrf.mxu1 }
 0x434   :  { %729 = vst [vmem:[#allocation4] sm:$0xff] %v715_v62 }
 0x435   :  { %v906_v63 = vpop.f32.mrf.mxu1 }
 0x437   :  { %v718_v0 = vpop.f32.mrf.mxu1 }
 0x438   :  { %730 = vst [vmem:[#allocation4 + $0x8] sm:$0xff] %v718_v0 }
 0x439   :  { %959 = shalt.err (!%p956_p4)
}
 0x43a   :  { %s971_s4 = smov 128   ;;  %s972_s29 = smov 8  }
 0x43b   :  { %743 = dma.vmem_to_hbm [thread:$0]  %s738_s3, 384, %s1185_s11, [#allocation5], %s971_s4, %s971_s4, %s972_s29  }
 0x43c   :  { %968 = dma.done.wait [#allocation5], 384  }
 0x43d   :  { %969 = vsyncadd [#allocation5], 4294966912 }
 0x43e   :  { %747 = vsyncpa [#allocation5], 1 }

</bundles_post_ra>
